<compile_context>
chip_gen: v7x
topology: tpu7x:2x2x1
jax: 0.10.0
libtpu: 0.0.40
codegen_flags: <defaults>
</compile_context>

<pallas_src>
import functools

import jax
import jax.numpy as jnp
import numpy as np
from jax.experimental import pallas as pl
from jax.experimental.pallas import tpu as pltpu

_BIG = 1e30          # sentinel for padded rows/cols (softplus(-_BIG) == 0 exactly)
_MASK_THRESH = 1e29


def _round_up(x, m):
    return ((x + m - 1) // m) * m


def _softplus(x):
    # numerically stable softplus;  BCE_with_logits(x, 1) = softplus(-x),
    #                               BCE_with_logits(x, 0) = softplus(+x)
    return jnp.maximum(x, 0.0) + jnp.log1p(jnp.exp(-jnp.abs(x)))


def _nce_loss_kernel(tgt_ref,                                    # scalar prefetch (N_pad,) i32, SMEM
                     h_ref, w_hbm, rowc_ref, nwt_ref, colc_ref,  # inputs
                     out_ref,                                    # (1,1,1) partial loss
                     tw_ref, sem,                                # scratch: (tile_n,H) VMEM + DMA sem
                     *, tile_n):
    base = pl.program_id(0) * tile_n

    # --- gather weight[targets[base : base+tile_n]] rows, HBM -> VMEM scratch ---
    @pl.loop(0, tile_n)
    def _start(r):
        row = tgt_ref[base + r]
        pltpu.make_async_copy(w_hbm.at[pl.ds(row, 1)], tw_ref.at[pl.ds(r, 1)], sem).start()

    @pl.loop(0, tile_n)
    def _drain(r):
        # same-sized descriptor per issued copy -> waits for all gathers
        pltpu.make_async_copy(w_hbm.at[pl.ds(0, 1)], tw_ref.at[pl.ds(r, 1)], sem).wait()

    h = h_ref[...]                                    # (tile_n, H), native dtype
    rowc = rowc_ref[...]                              # (tile_n, 1)  bias[t]-log q(t)-log k (+BIG pad)
    colc = colc_ref[...]                              # (1, K_pad)   bias[s]-log q(s)-log k (-BIG pad)

    # target path: per-row dot (VPU multiply + XLU reduce), f32 accumulation
    rowdot = jnp.sum(h.astype(jnp.float32) * tw_ref[...].astype(jnp.float32),
                     axis=1, keepdims=True)           # (tile_n, 1)
    out_t = rowdot + rowc                             # label = 1

    # noise path: MXU matmul against pre-transposed (H, K_pad) noise weights
    out_n = jnp.dot(h, nwt_ref[...],
                    preferred_element_type=jnp.float32) + colc   # (tile_n, K_pad), label = 0

    row_mask = (rowc < _MASK_THRESH).astype(jnp.float32)         # 0.0 for padded rows

    # BCE-with-logits, reduction='sum' over this tile.
    pos = _softplus(-out_t)                  # padded rows: softplus(-BIG) == 0
    neg = _softplus(out_n) * row_mask        # padded cols: softplus(-BIG) == 0
    out_ref[...] = jnp.full((1, 1, 1), jnp.sum(pos) + jnp.sum(neg), dtype=jnp.float32)


def sampling_loss(weight, bias, hiddens, targets, samples, noise_probs, k,
                  *, tile_n=256, lane_pad=128):
    """NCE loss (obj='discri', q=b=g=1, fixed Z).
    weight (V,H), bias (V,), hiddens (...,H), targets (N,), samples (K,)."""
    if hiddens.ndim > 2:
        hiddens = hiddens.reshape(-1, hiddens.shape[-1])
    n, h_dim = hiddens.shape
    num_samples = int(samples.shape[0])
    log_k = float(np.log(k))

    # Categorical(noise).logits == log of the *normalized* probs.
    noise_logits = jnp.log(noise_probs) - jnp.log(jnp.sum(noise_probs))

    # ---- padding / tiling --------------------------------------------------
    tile_n = int(min(tile_n, _round_up(n, 8)))
    n_pad = _round_up(n, tile_n)
    k_pad = _round_up(num_samples, lane_pad)     # pad sample axis to full MXU lanes
    num_tiles = n_pad // tile_n

    h_p = jnp.pad(hiddens, ((0, n_pad - n), (0, 0)))                     # zero rows
    tgt_p = jnp.pad(targets.astype(jnp.int32), (0, n_pad - n))           # pad -> row 0 (valid)

    # folded per-row constant: bias[t] - noise_logits[t] - log k  (+BIG on padded rows)
    rowc = (bias[targets] - noise_logits[targets]).astype(jnp.float32) - log_k
    rowc = jnp.pad(rowc, (0, n_pad - n), constant_values=_BIG)[:, None]            # (N_pad, 1)

    # small (K,H) noise gather + transpose stays in XLA; presented as (H, K_pad)
    nw_t = jnp.pad(weight[samples].T, ((0, 0), (0, k_pad - num_samples)))          # (H, K_pad)

    # folded per-column constant (lane-dense): bias[s] - noise_logits[s] - log k
    colc = (bias[samples] - noise_logits[samples]).astype(jnp.float32) - log_k
    colc = jnp.pad(colc, (0, k_pad - num_samples), constant_values=-_BIG)[None, :]  # (1, K_pad)

    dsize = jnp.dtype(weight.dtype).itemsize
    cost = pl.CostEstimate(
        flops=int(2 * n_pad * k_pad * h_dim + 2 * n_pad * h_dim),
        transcendentals=int(2 * n_pad * (k_pad + 1)),
        bytes_accessed=int(n_pad * h_dim * (jnp.dtype(hiddens.dtype).itemsize + dsize)
                           + h_dim * k_pad * dsize + (n_pad + k_pad) * 4))

    grid_spec = pltpu.PrefetchScalarGridSpec(
        num_scalar_prefetch=1,
        grid=(num_tiles,),
        in_specs=[
            pl.BlockSpec((tile_n, h_dim), lambda i, tgt: (i, 0)),   # hiddens tile
            pl.BlockSpec(memory_space=pl.ANY),                      # weight: stays in HBM
            pl.BlockSpec((tile_n, 1), lambda i, tgt: (i, 0)),       # folded row constants
            pl.BlockSpec((h_dim, k_pad), lambda i, tgt: (0, 0)),    # noise W^T (resident)
            pl.BlockSpec((1, k_pad), lambda i, tgt: (0, 0)),        # folded col constants
        ],
        out_specs=pl.BlockSpec((1, 1, 1), lambda i, tgt: (i, 0, 0)),
        scratch_shapes=[
            pltpu.VMEM((tile_n, h_dim), weight.dtype),              # gathered target rows
            pltpu.SemaphoreType.DMA(()),
        ],
    )

    partials = pl.pallas_call(
        functools.partial(_nce_loss_kernel, tile_n=tile_n),
        out_shape=jax.ShapeDtypeStruct((num_tiles, 1, 1), jnp.float32),
        grid_spec=grid_spec,
        compiler_params=pltpu.CompilerParams(
            dimension_semantics=("parallel",),        # v7x: tiles split over both TCs
            vmem_limit_bytes=48 * 1024 * 1024),       # explicit budget; fits v7x 64 MiB
        cost_estimate=cost,
    )(tgt_p, h_p, weight, rowc, nw_t, colc)

    return (jnp.sum(partials) / n).astype(weight.dtype)     # .type_as(weight)


def _reference_loss(weight, bias, hiddens, targets, samples, noise_probs, k):
    """Pure-JAX reference mirroring the PyTorch default-NCE branch."""
    h = hiddens.reshape(-1, hiddens.shape[-1]).astype(jnp.float32)
    w = weight.astype(jnp.float32)
    nl = jnp.log(noise_probs / jnp.sum(noise_probs))
    tm = jnp.sum(h * w[targets], axis=1, keepdims=True) + bias[targets][:, None]
    nm = h @ w[samples].T + bias[samples][None, :]
    model_logits = jnp.concatenate([tm, nm], axis=1)
    noise_logits = jnp.concatenate(
        [nl[targets][:, None], jnp.broadcast_to(nl[samples][None, :], nm.shape)], axis=1)
    out = model_logits - noise_logits - jnp.log(float(k))
    labels = jnp.zeros_like(out).at[:, 0].set(1.0)
    bce = jnp.maximum(out, 0.0) - out * labels + jnp.log1p(jnp.exp(-jnp.abs(out)))
    return jnp.sum(bce) / h.shape[0]


if __name__ == "__main__":
    key = jax.random.PRNGKey(0)
    k1, k2, k3, k4, k5, k6 = jax.random.split(key, 6)

    V, H, B, S, K = 64, 32, 2, 4, 16        # vocab, hidden, batch, seq, #samples

    weight = jax.random.normal(k1, (V, H), jnp.float32) * 0.1
    bias = jax.random.normal(k2, (V,), jnp.float32) * 0.1
    hiddens = jax.random.normal(k3, (B, S, H), jnp.float32)
    targets = jax.random.randint(k4, (B * S,), 0, V)
    noise_probs = jax.random.uniform(k5, (V,), jnp.float32) + 0.1

    # torch.multinomial(noise.probs, k, replacement=True) equivalent; the
    # stochastic draw is host-side glue, not part of the kernel hot path.
    samples = jax.random.categorical(
        k6, jnp.log(noise_probs / jnp.sum(noise_probs)), shape=(K,))

    loss = sampling_loss(weight, bias, hiddens, targets, samples, noise_probs, K)
    loss = jax.block_until_ready(loss)

    ref = _reference_loss(weight, bias, hiddens, targets, samples, noise_probs, K)
    # all-f32 math; slightly loose tol guards against MXU f32 multi-pass /
    # reduction-order reassociation differences vs. the XLA reference.
    np.testing.assert_allclose(np.asarray(loss), np.asarray(ref), rtol=1e-4, atol=1e-4)

    print("KERNEL_OK")
</pallas_src>

<mosaic_0001>
module attributes {stable_mosaic.version = 11 : i64} {
  func.func @_nce_loss_kernel(%arg0: i32, %arg1: memref<8xi32, #tpu.memory_space<smem>>, %arg2: memref<8x32xf32, #tpu.memory_space<vmem>>, %arg3: memref<64x32xf32, #tpu.memory_space<any>>, %arg4: memref<8x1xf32, #tpu.memory_space<vmem>>, %arg5: memref<32x128xf32, #tpu.memory_space<vmem>>, %arg6: memref<1x128xf32, #tpu.memory_space<vmem>>, %arg7: memref<1x1x1xf32, #tpu.memory_space<vmem>>, %arg8: memref<8x32xf32, #tpu.memory_space<vmem>>, %arg9: memref<!tpu.dma_semaphore, #tpu.memory_space<semaphore_mem>>) attributes {dimension_semantics = [#tpu.dimension_semantics<parallel>], iteration_bounds = array<i64: 1>, scalar_prefetch = 1 : i64, scratch_operands = 2 : i64, tpu.core_type = #tpu.core_type<tc>, window_params = [{transform_indices = @transform_0, window_bounds = array<i64: 8, 32>}, {}, {transform_indices = @transform_2, window_bounds = array<i64: 8, 1>}, {pipeline_mode = #tpu.pipeline_mode<synchronous>, transform_indices = @transform_3, window_bounds = array<i64: 32, 128>}, {pipeline_mode = #tpu.pipeline_mode<synchronous>, transform_indices = @transform_4, window_bounds = array<i64: 1, 128>}, {transform_indices = @transform_5, window_bounds = array<i64: 1, 1, 1>}]} {
    %c8_i32 = arith.constant 8 : i32
    %0 = arith.muli %arg0, %c8_i32 : i32
    %c0_i32 = arith.constant 0 : i32
    %c8_i32_0 = arith.constant 8 : i32
    %1 = arith.addi %c0_i32, %c8_i32_0 : i32
    %c1_i32 = arith.constant 1 : i32
    scf.for %arg10 = %c0_i32 to %1 step %c1_i32  : i32 {
      %c1_i32_27 = arith.constant 1 : i32
      %50 = arith.muli %arg10, %c1_i32_27 : i32
      %c0_i32_28 = arith.constant 0 : i32
      %51 = arith.addi %c0_i32_28, %50 : i32
      %52 = arith.addi %0, %51 : i32
      %53 = arith.index_cast %52 : i32 to index
      %54 = memref.load %arg1[%53] : memref<8xi32, #tpu.memory_space<smem>>
      %c0_i32_29 = arith.constant 0 : i32
      %55 = tpu.memref_slice %arg3[%54, %c0_i32_29] : memref<64x32xf32, #tpu.memory_space<any>> -> memref<1x32xf32, #tpu.memory_space<any>>
      %c0_i32_30 = arith.constant 0 : i32
      %56 = tpu.memref_slice %arg8[%51, %c0_i32_30] : memref<8x32xf32, #tpu.memory_space<vmem>> -> memref<1x32xf32, #tpu.memory_space<vmem>>
      tpu.enqueue_dma source(%55 : memref<1x32xf32, #tpu.memory_space<any>>) target(%56 : memref<1x32xf32, #tpu.memory_space<vmem>>) target_semaphore(%arg9 : memref<!tpu.dma_semaphore, #tpu.memory_space<semaphore_mem>>)
    }
    %c8_i32_1 = arith.constant 8 : i32
    %c0_i32_2 = arith.constant 0 : i32
    %c8_i32_3 = arith.constant 8 : i32
    %2 = arith.addi %c0_i32_2, %c8_i32_3 : i32
    %c1_i32_4 = arith.constant 1 : i32
    scf.for %arg10 = %c0_i32_2 to %2 step %c1_i32_4  : i32 {
      %c1_i32_27 = arith.constant 1 : i32
      %50 = arith.muli %arg10, %c1_i32_27 : i32
      %c0_i32_28 = arith.constant 0 : i32
      %51 = arith.addi %c0_i32_28, %50 : i32
      %c0_i32_29 = arith.constant 0 : i32
      %c0_i32_30 = arith.constant 0 : i32
      %52 = tpu.memref_slice %arg3[%c0_i32_29, %c0_i32_30] : memref<64x32xf32, #tpu.memory_space<any>> -> memref<1x32xf32, #tpu.memory_space<any>>
      %c0_i32_31 = arith.constant 0 : i32
      %53 = tpu.memref_slice %arg8[%51, %c0_i32_31] : memref<8x32xf32, #tpu.memory_space<vmem>> -> memref<1x32xf32, #tpu.memory_space<vmem>>
      tpu.wait_dma2 semaphore(%arg9 : memref<!tpu.dma_semaphore, #tpu.memory_space<semaphore_mem>>) src(%52 : memref<1x32xf32, #tpu.memory_space<any>>) dst(%53 : memref<1x32xf32, #tpu.memory_space<vmem>>)
    }
    %c8_i32_5 = arith.constant 8 : i32
    %c0 = arith.constant 0 : index
    %c0_6 = arith.constant 0 : index
    %3 = vector.load %arg2[%c0, %c0_6] : memref<8x32xf32, #tpu.memory_space<vmem>>, vector<8x32xf32>
    %c0_7 = arith.constant 0 : index
    %c0_8 = arith.constant 0 : index
    %4 = vector.load %arg4[%c0_7, %c0_8] : memref<8x1xf32, #tpu.memory_space<vmem>>, vector<8x1xf32>
    %c0_9 = arith.constant 0 : index
    %c0_10 = arith.constant 0 : index
    %5 = vector.load %arg6[%c0_9, %c0_10] : memref<1x128xf32, #tpu.memory_space<vmem>>, vector<1x128xf32>
    %c0_11 = arith.constant 0 : index
    %c0_12 = arith.constant 0 : index
    %6 = vector.load %arg8[%c0_11, %c0_12] : memref<8x32xf32, #tpu.memory_space<vmem>>, vector<8x32xf32>
    %7 = arith.mulf %3, %6 : vector<8x32xf32>
    %cst = arith.constant dense<0.000000e+00> : vector<8xf32>
    %8 = vector.multi_reduction <add>, %7, %cst [1] : vector<8x32xf32> to vector<8xf32>
    %9 = vector.shape_cast %8 : vector<8xf32> to vector<8x1xf32>
    %10 = arith.addf %9, %4 : vector<8x1xf32>
    %c0_13 = arith.constant 0 : index
    %c0_14 = arith.constant 0 : index
    %11 = vector.load %arg5[%c0_13, %c0_14] : memref<32x128xf32, #tpu.memory_space<vmem>>, vector<32x128xf32>
    %cst_15 = arith.constant dense<0.000000e+00> : vector<8x128xf32>
    %12 = tpu.matmul %3, %11, %cst_15 {dimension_numbers = #tpu.dot_dimension_numbers<[1], [0], [0], [1], [0, 0, 1, 1], [], []>} : vector<8x32xf32>, vector<32x128xf32>, vector<8x128xf32> -> vector<8x128xf32>
    %13 = vector.broadcast %5 : vector<1x128xf32> to vector<8x128xf32>
    %14 = arith.addf %12, %13 : vector<8x128xf32>
    %cst_16 = arith.constant 1.000000e+29 : f32
    %15 = vector.broadcast %cst_16 : f32 to vector<8x1xf32>
    %16 = arith.cmpf olt, %4, %15 : vector<8x1xf32>
    %17 = arith.extui %16 : vector<8x1xi1> to vector<8x1xi32>
    %18 = arith.sitofp %17 : vector<8x1xi32> to vector<8x1xf32>
    %cst_17 = arith.constant 0.000000e+00 : f32
    %19 = vector.broadcast %cst_17 : f32 to vector<8x1xf32>
    %20 = arith.subf %19, %10 : vector<8x1xf32>
    %cst_18 = arith.constant 0.000000e+00 : f32
    %21 = vector.broadcast %cst_18 : f32 to vector<8x1xf32>
    %22 = arith.maximumf %20, %21 : vector<8x1xf32>
    %23 = math.absf %20 : vector<8x1xf32>
    %cst_19 = arith.constant 0.000000e+00 : f32
    %24 = vector.broadcast %cst_19 : f32 to vector<8x1xf32>
    %25 = arith.subf %24, %23 : vector<8x1xf32>
    %26 = math.exp %25 : vector<8x1xf32>
    %27 = math.log1p %26 : vector<8x1xf32>
    %28 = arith.addf %22, %27 : vector<8x1xf32>
    %cst_20 = arith.constant 0.000000e+00 : f32
    %29 = vector.broadcast %cst_20 : f32 to vector<8x128xf32>
    %30 = arith.maximumf %14, %29 : vector<8x128xf32>
    %31 = math.absf %14 : vector<8x128xf32>
    %cst_21 = arith.constant 0.000000e+00 : f32
    %32 = vector.broadcast %cst_21 : f32 to vector<8x128xf32>
    %33 = arith.subf %32, %31 : vector<8x128xf32>
    %34 = math.exp %33 : vector<8x128xf32>
    %35 = math.log1p %34 : vector<8x128xf32>
    %36 = arith.addf %30, %35 : vector<8x128xf32>
    %37 = vector.broadcast %18 : vector<8x1xf32> to vector<8x128xf32>
    %38 = arith.mulf %36, %37 : vector<8x128xf32>
    %39 = vector.shape_cast %28 : vector<8x1xf32> to vector<1x8x1xf32>
    %cst_22 = arith.constant dense<0.000000e+00> : vector<1xf32>
    %40 = vector.multi_reduction <add>, %39, %cst_22 [1, 2] : vector<1x8x1xf32> to vector<1xf32>
    %41 = vector.shape_cast %40 : vector<1xf32> to vector<1x1x1xf32>
    %42 = vector.extract %41[0, 0, 0] : f32 from vector<1x1x1xf32>
    %43 = vector.shape_cast %38 : vector<8x128xf32> to vector<1x8x128xf32>
    %cst_23 = arith.constant dense<0.000000e+00> : vector<1xf32>
    %44 = vector.multi_reduction <add>, %43, %cst_23 [1, 2] : vector<1x8x128xf32> to vector<1xf32>
    %45 = vector.shape_cast %44 : vector<1xf32> to vector<1x1x1xf32>
    %46 = vector.extract %45[0, 0, 0] : f32 from vector<1x1x1xf32>
    %47 = arith.addf %42, %46 : f32
    %48 = vector.broadcast %47 : f32 to vector<1x1x1xf32>
    %c0_24 = arith.constant 0 : index
    %c0_25 = arith.constant 0 : index
    %c0_26 = arith.constant 0 : index
    %49 = vector.load %arg7[%c0_24, %c0_25, %c0_26] : memref<1x1x1xf32, #tpu.memory_space<vmem>>, vector<1x1x1xf32>
    tpu.vector_store %arg7[%c0_24, %c0_25, %c0_26], %48 {strides = array<i32>} : memref<1x1x1xf32, #tpu.memory_space<vmem>>, vector<1x1x1xf32>,
    return
  }
  func.func @transform_0(%arg0: i32, %arg1: memref<8xi32, #tpu.memory_space<smem>>) -> (i32, i32) {
    %c0_i32 = arith.constant 0 : i32
    %c0_i32_0 = arith.constant 0 : i32
    return %arg0, %c0_i32 : i32, i32
  }
  func.func @transform_2(%arg0: i32, %arg1: memref<8xi32, #tpu.memory_space<smem>>) -> (i32, i32) {
    %c0_i32 = arith.constant 0 : i32
    %c0_i32_0 = arith.constant 0 : i32
    return %arg0, %c0_i32 : i32, i32
  }
  func.func @transform_3(%arg0: i32, %arg1: memref<8xi32, #tpu.memory_space<smem>>) -> (i32, i32) {
    %c0_i32 = arith.constant 0 : i32
    %c0_i32_0 = arith.constant 0 : i32
    %c0_i32_1 = arith.constant 0 : i32
    return %c0_i32, %c0_i32_0 : i32, i32
  }
  func.func @transform_4(%arg0: i32, %arg1: memref<8xi32, #tpu.memory_space<smem>>) -> (i32, i32) {
    %c0_i32 = arith.constant 0 : i32
    %c0_i32_0 = arith.constant 0 : i32
    %c0_i32_1 = arith.constant 0 : i32
    return %c0_i32, %c0_i32_0 : i32, i32
  }
  func.func @transform_5(%arg0: i32, %arg1: memref<8xi32, #tpu.memory_space<smem>>) -> (i32, i32, i32) {
    %c0_i32 = arith.constant 0 : i32
    %c0_i32_0 = arith.constant 0 : i32
    %c0_i32_1 = arith.constant 0 : i32
    return %arg0, %c0_i32, %c0_i32_0 : i32, i32, i32
  }
}

</mosaic_0001>

<bundles_post_ra>
// kernel: tpu_custom_call.1
= control target key start
LH: loop header
LB: loop body
LE: loop exit
PB: predicated region body
PF: predicated region fallthrough
CT: control target
= control target key end

     0   :  { %s486_s0 = inlined_call_operand.vmem [shape: s32[8], index: 0, kind: input, shape index: {}]   ;;  %s487_s1 = inlined_call_operand.vmem [shape: f32[8,32], index: 1, kind: input, shape index: {}]   ;;  %s488_s2 = inlined_call_operand.vmem [shape: f32[64,32], index: 2, kind: input, shape index: {}]   ;;  %s489_s3 = inlined_call_operand.vmem [shape: f32[8,1], index: 3, kind: input, shape index: {}]   ;;  %s490_s4 = inlined_call_operand.vmem [shape: f32[32,128], index: 4, kind: input, shape index: {}]   ;;  %s491_s5 = inlined_call_operand.vmem [shape: f32[1,128], index: 5, kind: input, shape index: {}]   ;;  %s492_s6 = inlined_call_operand.hbm [shape: f32[1,1,1], index: 6, kind: output, shape index: {}]  }
   0x1   :  { %s11_s23 = sshll.u32 %s486_s0, 4  ;;  %s12_s23 = int_to_ptr.vmem [resolvable:$true] %s11_s23 }
   0x2   :  { %s350_s24 = scalar_lea.vmem %s12_s23, 16  ;;  %p355_p1 = scmp.lt.s32.totalorder %s12_s23, %s12_s23 }
   0x3   :  { %p351_p0 = scmp.ne.s32.totalorder %s12_s23, %s350_s24  ;;  %p356_p2 = scmp.lt.s32.totalorder %s350_s24, %s350_s24 }
   0x5   :  { %p357_p3 = por %p356_p2, %p355_p1 }
   0x7   :  { %p358_p4 = pnand %p357_p3, %p351_p0 }
   0x9   :  { %361 = shalt.err (!%p358_p4)  }
   0xa   :  { %s406_s25 = smov [#allocation5]  }
   0xb   :  { %14 = dma.vmem_to_smem %s12_s23, 16, %s406_s25, [#allocation4] }
   0xc   :  { %392 = dma.done.wait [#allocation4], 16 }
   0xd   :  { %393 = vsyncadd [#allocation4], 4294967280 }
   0xe   :  { %16 = sfence }
   0xf   :  { %17 = vsyncpa [#allocation7], 0  ;;  %s398_s26 = smov 0  }
  0x10 LB: > { %s34_s27 = sld [smem:[#allocation5 + %s400_s26]]  ;;  %s36_s30 = scalar_lea.vmem [#allocation2], %s400_s26  ;;  %s400_s26 = sphi %s398_s26, %s32_s26  }
  0x16   : > { %s35_s29 = scalar_lea.vmem %s488_s2, %s34_s27 }
  0x17   : > { %v54_v0 = vld [vmem:[%s35_s29] sm:$0x1] }
  0x18   : > { %55 = vst [vmem:[%s36_s30] sm:$0x1] %v54_v0 }
  0x19   : > { %80 = vsyncadd [#allocation3], 16  ;;  %s32_s26 = sadd.s32 1, %s400_s26  }
  0x1a   : > { %p29_p5 = scmp.ge.s32.totalorder %s32_s26, 8  }
  0x1b   :  { %s402_s7 = smov (%p29_p5), 0  }
  0x1c   :  { %31 = sbr.rel (!%p29_p5) target bundleno = 16 (0x10), region = 92 }
  0x23 LB: > { %394 = dma.done.wait [#allocation3], 16  ;;  %s404_s7 = sphi %s402_s7, %s86_s7  }
  0x24   : > { %395 = vsyncadd [#allocation3], 4294967280  ;;  %s86_s7 = sadd.s32 1, %s404_s7  }
  0x25   : > { %p83_p6 = scmp.ge.s32.totalorder %s86_s7, 8  }
  0x26   :  { %v100_v1 = vld [vmem:[%s490_s4] sm:$0xff] (%p83_p6)  ;;  %v101_v2 = vld [vmem:[%s490_s4 + $0x8] sm:$0xff] (%p83_p6)  ;;  %v102_v3 = vld [vmem:[%s490_s4 + $0x10] sm:$0xff] (%p83_p6)  ;;  %v407_v4 = vmov (%p83_p6), 0.0|0.0   ;;  %vm408_vm0 = vmmov (%p83_p6), 0   ;;  %v409_v7 = vmov (%p83_p6), 0.0  }
  0x27   :  { %85 = sbr.rel (!%p83_p6) target bundleno = 35 (0x23), region = 103  ;;  %309 = vmatprep.subr.bf16.mxu0 (%p83_p6), %v407_v4  ;;  %v310_v5 = vpack.c.bf16 (%p83_p6), %v101_v2, %v100_v1  ;;  %v103_v6 = vld [vmem:[%s490_s4 + $0x18] sm:$0xff] (%p83_p6)  ;;  %306 = vmatprep.mubr.msk.f32.mxu0 (%p83_p6), %vm408_vm0, %v409_v7  ;;  %v90_v8 = vld [vmem:[%s487_s1] sm:$0xff] (%p83_p6)  ;;  %v410_v10 = vmov (%p83_p6), 0   ;;  %vm95_vm1 = vcmask (%p83_p6), 261120   ;;  %vm223_vm4 = vcmask (%p83_p6), 7168  }
  0x28   :  { %v93_v9 = vld [vmem:[#allocation2] sm:$0xff] (%p83_p6)  ;;  %341 = vset.pattern.permute.xlu0 (%p83_p6), %v410_v10  ;;  %v313_v11 = vpack.c.bf16 (%p83_p6), %v103_v6, %v102_v3  ;;  %s411_s18 = smov (%p83_p6), [#allocation6]   ;;  %vm245_vm6 = vcmask (%p83_p6), 0  }
  0x29   :  { %311 = vmatpush3.bf16.msra.mxu0 (%p83_p6), %v310_v5  ;;  %v94_v12 = vmul.f32 (%p83_p6), %v93_v9, %v90_v8  ;;  %v91_v14 = vld [vmem:[%s489_s3] sm:$0xff] (%p83_p6)  ;;  %s253_s19 = sshll.u32 (%p83_p6), %s411_s18, 4  ;;  %s254_s19 = int_to_ptr.vmem [resolvable:$true] %s253_s19 }
  0x2a   :  { %312 = vmatprep.subr.bf16.mxu0 (%p83_p6), %v407_v4  ;;  %vm183_vm2 = vcmp.lt.f32.partialorder (%p83_p6), %v91_v14, 1e+29  ;;  %v289_v34 = vld [vmem:[%s491_s5] ss:$0 sm:$0xff] (%p83_p6)  ;;  %s362_s22 = scalar_lea.vmem (%p83_p6), %s254_s19, 16  ;;  %s366_s23 = scalar_lea.vmem (%p83_p6), %s254_s19, 32 }
  0x2b   :  { %v96_v13 = vsel (%p83_p6), %vm95_vm1, %v94_v12, 0.0  ;;  %v291_v15 = vsel (%p83_p6), %vm183_vm2, 1.0, %v409_v7  ;;  %p363_p7 = scmp.ne.s32.totalorder (%p83_p6), %s254_s19, %s362_s22  ;;  %p367_p8 = scmp.lt.s32.totalorder (%p83_p6), %s254_s19, %s254_s19 }
  0x2c   :  { %97 = vadd.xlane.f32.xlu0 (%p83_p6), %v96_v13  ;;  %p368_p9 = scmp.lt.s32.totalorder (%p83_p6), %s366_s23, %s362_s22 }
  0x2d   :  { %314 = vmatpush3.bf16.msra.mxu0 (%p83_p6), %v313_v11 }
  0x2e   :  { %p369_p10 = por %p368_p9, %p367_p8 }
  0x30   :  { %307 = vmatmul.mubr.msk.f32.vlgmr.msra.gmra.mrb[0].mxu0 %vm95_vm1, %v90_v8  ;;  %p370_p11 = pnand %p369_p10, %p363_p7 }
  0x42   :  { %219 = vperm.xlu0 %341, %v291_v15  }
  0xb9   :  { %v98_v16 = vpop.xlane.xlu0 %97 }
  0xba   :  { %v99_v17 = vadd.f32 %v98_v16, %v91_v14 }
  0xbc   :  { %v186_v18 = vsub.f32 0.0, %v99_v17 }
  0xbe   :  { %v188_v19 = vand.u32 2147483647, %v186_v18  ;;  %v187_v29 = vmax.f32 %v186_v18, 0.0 }
  0xc0   :  { %v189_v20 = vsub.f32 0.0, %v188_v19 }
  0xc1   :  { %v220_v51 = vpop.permute.xlu0 %219 }
  0xc2   :  { %v190_v21 = vmul.f32 1.442695, %v189_v20 }
  0xc4   :  { %342 = vpow2.f32 %v190_v21 }
  0xce   :  { %v343_v22 = vpop.eup %342 }
  0xcf   :  { %v192_v23 = vadd.f32 1.0, %v343_v22  ;;  %v195_v24 = vmul.f32 -0.5, %v343_v22  ;;  %v198_v26 = vand.u32 2147483647, %v343_v22 }
  0xd1   :  { %344 = vlog2.f32 %v192_v23  ;;  %v196_v25 = vadd.f32 1.0, %v195_v24  ;;  %vm199_vm3 = vcmp.lt.f32.partialorder %v198_v26, 0.0004427343 }
  0xd3   :  { %v197_v27 = vmul.f32 %v343_v22, %v196_v25 }
  0xdb   :  { %v345_v28 = vpop.eup %344 }
  0xdc   :  { %v194_v30 = vmul.f32 0.6931472, %v345_v28 }
  0xde   :  { %v200_v31 = vsel %vm199_vm3, %v197_v27, %v194_v30 }
  0xdf   :  { %v201_v32 = vadd.f32 %v200_v31, %v187_v29 }
  0xe1   :  { %v224_v33 = vsel %vm223_vm4, %v201_v32, 0.0 }
  0xe2   :  { %225 = vadd.xlane.f32.xlu1 %v224_v33 }
 0x103   :  { %v179_v35 = vpop.f32.mrb[0].mxu0 }
 0x104   :  { %v180_v36 = vadd.f32 %v289_v34, %v179_v35  ;;  %v308_v37 = vpop.f32.mrb[1].mxu0 }
 0x106   :  { %v203_v38 = vand.u32 2147483647, %v180_v36  ;;  %v202_v49 = vmax.f32 %v180_v36, 0.0 }
 0x108   :  { %v204_v39 = vsub.f32 0.0, %v203_v38 }
 0x10a   :  { %v205_v40 = vmul.f32 1.442695, %v204_v39 }
 0x10c   :  { %346 = vpow2.f32 %v205_v40 }
 0x116   :  { %v347_v41 = vpop.eup %346 }
 0x117   :  { %v207_v42 = vadd.f32 1.0, %v347_v41  ;;  %v210_v43 = vmul.f32 -0.5, %v347_v41  ;;  %v213_v45 = vand.u32 2147483647, %v347_v41 }
 0x119   :  { %348 = vlog2.f32 %v207_v42  ;;  %v211_v44 = vadd.f32 1.0, %v210_v43  ;;  %vm214_vm5 = vcmp.lt.f32.partialorder %v213_v45, 0.0004427343 }
 0x11b   :  { %v212_v48 = vmul.f32 %v347_v41, %v211_v44 }
 0x123   :  { %v349_v46 = vpop.eup %348 }
 0x124   :  { %v209_v47 = vmul.f32 0.6931472, %v349_v46 }
 0x126   :  { %v215_v50 = vsel %vm214_vm5, %v212_v48, %v209_v47 }
 0x127   :  { %v216_v52 = vadd.f32 %v215_v50, %v202_v49 }
 0x129   :  { %v222_v53 = vmul.f32 %v220_v51, %v216_v52 }
 0x12b   :  { %234 = vadd.xlane.f32.xlu1 %v222_v53 }
 0x16f   :  { %v226_v54 = vpop.xlane.xlu1 %225 }
 0x170   :  { %v227_v55 = vrot.slane %v226_v54, 4 }
 0x172   :  { %v228_v56 = vadd.f32 %v227_v55, %v226_v54 }
 0x174   :  { %v229_v57 = vrot.slane %v228_v56, 2 }
 0x176   :  { %v230_v58 = vadd.f32 %v229_v57, %v228_v56 }
 0x178   :  { %v231_v59 = vrot.slane %v230_v58, 1 }
 0x17a   :  { %v232_v60 = vadd.f32 %v231_v59, %v230_v58 }
 0x17c   :  { %315 = vpush %v232_v60 }
 0x1ad   :  { %s316_s5 = spop %315 }
 0x1b8   :  { %v235_v61 = vpop.xlane.xlu1 %234 }
 0x1b9   :  { %v236_v62 = vrot.slane %v235_v61, 4 }
 0x1bb   :  { %v237_v63 = vadd.f32 %v236_v62, %v235_v61 }
 0x1bd   :  { %v238_v0 = vrot.slane %v237_v63, 2 }
 0x1bf   :  { %v239_v1 = vadd.f32 %v238_v0, %v237_v63 }
 0x1c1   :  { %v240_v2 = vrot.slane %v239_v1, 1 }
 0x1c3   :  { %v241_v3 = vadd.f32 %v240_v2, %v239_v1 }
 0x1c5   :  { %317 = vpush %v241_v3 }
 0x1f6   :  { %s318_s20 = spop %317 }
 0x1f7   :  { %s243_s21 = sadd.f32 %s318_s20, %s316_s5 }
 0x1f9   :  { %v244_v4 = vstv %s243_s21 }
 0x1fa   :  { %246 = vst.msk [vmem:[#allocation6] sm:$0x1] %vm245_vm6, %v244_v4 }
 0x1fb   :  { %373 = shalt.err (!%p370_p11)
}
 0x1fc   :  { %s374_s26 = scalar_lea.hbm %s492_s6, 16 }
 0x1fd   :  { %p375_p12 = scmp.ne.s32.totalorder %s492_s6, %s374_s26  ;;  %p378_p13 = scmp.lt.u32.totalorder %s374_s26, %s492_s6 }
 0x1ff   :  { %p380_p0 = pnand %p378_p13, %p375_p12 }
 0x201   :  { %383 = shalt.err (!%p380_p0)
}
 0x202   :  { %256 = dma.vmem_to_hbm [thread:$0]  %s254_s19, 16, %s492_s6, [#allocation7]  }
 0x203   :  { %396 = dma.done.wait [#allocation7], 16  }
 0x204   :  { %397 = vsyncadd [#allocation7], 4294967280 }
 0x205   :  { %260 = vsyncpa [#allocation7], 1 }
 0x206   :  { %261 = vsyncmov [#allocation3] }
 0x209   :  { %s262_s8 = vpop.sfrf %261 }
 0x20a   :  { %p292_p1 = scmp.ne.s32.totalorder %s262_s8, 0 }
 0x20c   :  { %266 = shalt.err (%p292_p1)  }

</bundles_post_ra>
